<compile_context>
chip_gen: v7x
topology: tpu7x:2x2x1
jax: 0.10.0
libtpu: 0.0.40
codegen_flags: <defaults>
</compile_context>

<pallas_src>
import jax
import jax.numpy as jnp
from jax.experimental import pallas as pl
from jax.experimental.pallas import tpu as pltpu


IN_F = 2   # input features of linear1
HID = 4    # hidden width
OUT_F = 1  # output features of linear2


def _mlp_kernel(p_ref, x_ref, o_ref):
    """Fused Linear(2->4) -> tanh -> Linear(4->1), fully lane-parallel.

    p_ref : SMEM (17,) f32, packed [w1[0,:], w1[1,:], b1, w2[:,0], b2]
    x_ref : VMEM (2, TR, LANES) -- feature-0 plane and feature-1 plane
    o_ref : VMEM (TR, LANES)
    """
    # Hoist every scalar SMEM read once per tile (13 distinct splats).
    w1_0 = [p_ref[j] for j in range(HID)]           # w1[0, j]
    w1_1 = [p_ref[HID + j] for j in range(HID)]      # w1[1, j]
    b1 = [p_ref[2 * HID + j] for j in range(HID)]    # b1[j]
    w2 = [p_ref[3 * HID + j] for j in range(HID)]    # w2[j, 0]
    b2 = p_ref[4 * HID]                              # b2[0]

    x0 = x_ref[0]
    x1 = x_ref[1]

    acc = None
    for j in range(HID):  # static unroll over the 4 hidden units
        h = jnp.tanh(w1_0[j] * x0 + w1_1[j] * x1 + b1[j])  # tanh -> EUP slot
        if acc is None:
            acc = w2[j] * h + b2          # fold output bias into the first term
        else:
            acc = acc + w2[j] * h
    o_ref[...] = acc.astype(o_ref.dtype)


def _round_up(n, m):
    return ((n + m - 1) // m) * m


def mlp_forward(x, w1, b1, w2, b2, *, lanes=128, max_block_rows=8192):
    """x: (..., 2) -> (..., 1). Fused linear1 -> tanh -> linear2."""
    orig_shape = x.shape
    in_f, hid = w1.shape          # 2, 4
    out_f = w2.shape[1]           # 1
    assert orig_shape[-1] == in_f == IN_F and hid == HID and out_f == OUT_F

    x2d = x.reshape(-1, in_f)
    M = x2d.shape[0]

    # Single wrapper-side layout pass: de-interleave the two features into
    # lane-dense planes (rows on the lane axis).  Padding below only adds
    # < `lanes` rows of zeros, which is negligible HBM traffic.
    M_pad = _round_up(M, lanes)
    xt = x2d.T                                            # (2, M)
    if M_pad != M:
        xt = jnp.pad(xt, ((0, 0), (0, M_pad - M)))
    R = M_pad // lanes
    xt = xt.reshape(in_f, R, lanes)                       # (2, R, LANES)

    # All 17 parameters packed into one small SMEM array (scalar reads in-kernel).
    params = jnp.concatenate([
        w1[0, :].astype(jnp.float32),         # p[0:4]   = w1[0, j]
        w1[1, :].astype(jnp.float32),         # p[4:8]   = w1[1, j]
        b1.reshape(-1).astype(jnp.float32),   # p[8:12]  = b1[j]
        w2[:, 0].astype(jnp.float32),         # p[12:16] = w2[j, 0]
        b2.reshape(-1).astype(jnp.float32),   # p[16]    = b2[0]
    ])

    # Row-tile choice:
    #   - tiny inputs: a single full-extent tile (exempt from the 8-divisibility rule);
    #   - otherwise: aim for >= 2 grid steps so v7x's two TensorCores both get work,
    #     capped at `max_block_rows` so the double-buffered VMEM footprint stays
    #     ~24 MiB (inputs 16 MiB + output 8 MiB at 8192 x 128 f32 tiles).
    if R <= 16:
        tr = R
    else:
        tr = min(max_block_rows, _round_up(pl.cdiv(R, 2), 8))
    grid = (pl.cdiv(R, tr),)   # ragged last row-tile handled by masked writes

    out = pl.pallas_call(
        _mlp_kernel,
        out_shape=jax.ShapeDtypeStruct((R, lanes), x.dtype),
        grid_spec=pltpu.PrefetchScalarGridSpec(
            num_scalar_prefetch=0,
            grid=grid,
            in_specs=[
                pl.BlockSpec(memory_space=pltpu.MemorySpace.SMEM),     # params
                pl.BlockSpec((in_f, tr, lanes), lambda i: (0, i, 0)),  # x planes
            ],
            out_specs=pl.BlockSpec((tr, lanes), lambda i: (i, 0)),
        ),
        compiler_params=pltpu.CompilerParams(
            dimension_semantics=("parallel",),
            vmem_limit_bytes=40 * 1024 * 1024,   # > 24 MiB need; fixes v5e's 16 MiB default
        ),
    )(params, xt)

    y = out.reshape(-1)
    if M_pad != M:
        # Only taken when the row count is not a multiple of `lanes` (tail pad).
        y = y[:M]
    return y.reshape(orig_shape[:-1] + (out_f,))


def init_params(key):
    # Deterministic init mimicking PyTorch nn.Linear default
    # (U[-1/sqrt(fan_in), +1/sqrt(fan_in)]); stored as (in, out) so forward is x @ w.
    k1, k2, k3, k4 = jax.random.split(key, 4)
    lim1 = 1.0 / (IN_F ** 0.5)
    lim2 = 1.0 / (HID ** 0.5)
    w1 = jax.random.uniform(k1, (IN_F, HID), jnp.float32, -lim1, lim1)
    b1 = jax.random.uniform(k2, (HID,), jnp.float32, -lim1, lim1)
    w2 = jax.random.uniform(k3, (HID, OUT_F), jnp.float32, -lim2, lim2)
    b2 = jax.random.uniform(k4, (OUT_F,), jnp.float32, -lim2, lim2)
    return w1, b1, w2, b2


if __name__ == "__main__":
    key = jax.random.PRNGKey(0)
    kx, kx2, kp = jax.random.split(key, 3)

    w1, b1, w2, b2 = init_params(kp)
    fwd = jax.jit(mlp_forward)

    # Aligned case: 2*4*16 = 128 rows (multiple of `lanes`) -> zero-copy output path.
    x = jax.random.normal(kx, (2, 4, 16, 2), dtype=jnp.float32)
    y = jax.block_until_ready(fwd(x, w1, b1, w2, b2))
    ref = jnp.tanh(x @ w1 + b1) @ w2 + b2
    assert y.shape == (2, 4, 16, 1), y.shape
    assert jnp.allclose(y, ref, atol=1e-5, rtol=1e-5), float(jnp.max(jnp.abs(y - ref)))

    # Unaligned case (15 rows): exercises the padded-tail path.
    x2 = jax.random.normal(kx2, (3, 5, 2), dtype=jnp.float32)
    y2 = jax.block_until_ready(fwd(x2, w1, b1, w2, b2))
    ref2 = jnp.tanh(x2 @ w1 + b1) @ w2 + b2
    assert y2.shape == (3, 5, 1), y2.shape
    assert jnp.allclose(y2, ref2, atol=1e-5, rtol=1e-5), float(jnp.max(jnp.abs(y2 - ref2)))

    print("KERNEL_OK")
</pallas_src>

<mosaic_0001>
module attributes {stable_mosaic.version = 11 : i64} {
  func.func @_mlp_kernel(%arg0: i32, %arg1: memref<17xf32, #tpu.memory_space<smem>>, %arg2: memref<2x1x128xf32, #tpu.memory_space<vmem>>, %arg3: memref<1x128xf32, #tpu.memory_space<vmem>>) attributes {dimension_semantics = [#tpu.dimension_semantics<parallel>], iteration_bounds = array<i64: 1>, scalar_prefetch = 0 : i64, scratch_operands = 0 : i64, tpu.core_type = #tpu.core_type<tc>, window_params = [{transform_indices = @transform_0, window_bounds = array<i64: 17>}, {transform_indices = @transform_1, window_bounds = array<i64: 2, 1, 128>}, {transform_indices = @transform_2, window_bounds = array<i64: 1, 128>}]} {
    %c0 = arith.constant 0 : index
    %0 = memref.load %arg1[%c0] : memref<17xf32, #tpu.memory_space<smem>>
    %c1 = arith.constant 1 : index
    %1 = memref.load %arg1[%c1] : memref<17xf32, #tpu.memory_space<smem>>
    %c2 = arith.constant 2 : index
    %2 = memref.load %arg1[%c2] : memref<17xf32, #tpu.memory_space<smem>>
    %c3 = arith.constant 3 : index
    %3 = memref.load %arg1[%c3] : memref<17xf32, #tpu.memory_space<smem>>
    %c4 = arith.constant 4 : index
    %4 = memref.load %arg1[%c4] : memref<17xf32, #tpu.memory_space<smem>>
    %c5 = arith.constant 5 : index
    %5 = memref.load %arg1[%c5] : memref<17xf32, #tpu.memory_space<smem>>
    %c6 = arith.constant 6 : index
    %6 = memref.load %arg1[%c6] : memref<17xf32, #tpu.memory_space<smem>>
    %c7 = arith.constant 7 : index
    %7 = memref.load %arg1[%c7] : memref<17xf32, #tpu.memory_space<smem>>
    %c8 = arith.constant 8 : index
    %8 = memref.load %arg1[%c8] : memref<17xf32, #tpu.memory_space<smem>>
    %c9 = arith.constant 9 : index
    %9 = memref.load %arg1[%c9] : memref<17xf32, #tpu.memory_space<smem>>
    %c10 = arith.constant 10 : index
    %10 = memref.load %arg1[%c10] : memref<17xf32, #tpu.memory_space<smem>>
    %c11 = arith.constant 11 : index
    %11 = memref.load %arg1[%c11] : memref<17xf32, #tpu.memory_space<smem>>
    %c12 = arith.constant 12 : index
    %12 = memref.load %arg1[%c12] : memref<17xf32, #tpu.memory_space<smem>>
    %c13 = arith.constant 13 : index
    %13 = memref.load %arg1[%c13] : memref<17xf32, #tpu.memory_space<smem>>
    %c14 = arith.constant 14 : index
    %14 = memref.load %arg1[%c14] : memref<17xf32, #tpu.memory_space<smem>>
    %c15 = arith.constant 15 : index
    %15 = memref.load %arg1[%c15] : memref<17xf32, #tpu.memory_space<smem>>
    %c16 = arith.constant 16 : index
    %16 = memref.load %arg1[%c16] : memref<17xf32, #tpu.memory_space<smem>>
    %c0_0 = arith.constant 0 : index
    %c0_1 = arith.constant 0 : index
    %c0_2 = arith.constant 0 : index
    %17 = vector.load %arg2[%c0_0, %c0_1, %c0_2] : memref<2x1x128xf32, #tpu.memory_space<vmem>>, vector<1x1x128xf32>
    %18 = vector.shape_cast %17 : vector<1x1x128xf32> to vector<1x128xf32>
    %c1_3 = arith.constant 1 : index
    %c0_4 = arith.constant 0 : index
    %c0_5 = arith.constant 0 : index
    %19 = vector.load %arg2[%c1_3, %c0_4, %c0_5] : memref<2x1x128xf32, #tpu.memory_space<vmem>>, vector<1x1x128xf32>
    %20 = vector.shape_cast %19 : vector<1x1x128xf32> to vector<1x128xf32>
    %21 = vector.broadcast %0 : f32 to vector<1x128xf32>
    %22 = arith.mulf %21, %18 : vector<1x128xf32>
    %23 = vector.broadcast %4 : f32 to vector<1x128xf32>
    %24 = arith.mulf %23, %20 : vector<1x128xf32>
    %25 = arith.addf %22, %24 : vector<1x128xf32>
    %26 = vector.broadcast %8 : f32 to vector<1x128xf32>
    %27 = arith.addf %25, %26 : vector<1x128xf32>
    %28 = math.tanh %27 : vector<1x128xf32>
    %29 = vector.broadcast %12 : f32 to vector<1x128xf32>
    %30 = arith.mulf %29, %28 : vector<1x128xf32>
    %31 = vector.broadcast %16 : f32 to vector<1x128xf32>
    %32 = arith.addf %30, %31 : vector<1x128xf32>
    %33 = vector.broadcast %1 : f32 to vector<1x128xf32>
    %34 = arith.mulf %33, %18 : vector<1x128xf32>
    %35 = vector.broadcast %5 : f32 to vector<1x128xf32>
    %36 = arith.mulf %35, %20 : vector<1x128xf32>
    %37 = arith.addf %34, %36 : vector<1x128xf32>
    %38 = vector.broadcast %9 : f32 to vector<1x128xf32>
    %39 = arith.addf %37, %38 : vector<1x128xf32>
    %40 = math.tanh %39 : vector<1x128xf32>
    %41 = vector.broadcast %13 : f32 to vector<1x128xf32>
    %42 = arith.mulf %41, %40 : vector<1x128xf32>
    %43 = arith.addf %32, %42 : vector<1x128xf32>
    %44 = vector.broadcast %2 : f32 to vector<1x128xf32>
    %45 = arith.mulf %44, %18 : vector<1x128xf32>
    %46 = vector.broadcast %6 : f32 to vector<1x128xf32>
    %47 = arith.mulf %46, %20 : vector<1x128xf32>
    %48 = arith.addf %45, %47 : vector<1x128xf32>
    %49 = vector.broadcast %10 : f32 to vector<1x128xf32>
    %50 = arith.addf %48, %49 : vector<1x128xf32>
    %51 = math.tanh %50 : vector<1x128xf32>
    %52 = vector.broadcast %14 : f32 to vector<1x128xf32>
    %53 = arith.mulf %52, %51 : vector<1x128xf32>
    %54 = arith.addf %43, %53 : vector<1x128xf32>
    %55 = vector.broadcast %3 : f32 to vector<1x128xf32>
    %56 = arith.mulf %55, %18 : vector<1x128xf32>
    %57 = vector.broadcast %7 : f32 to vector<1x128xf32>
    %58 = arith.mulf %57, %20 : vector<1x128xf32>
    %59 = arith.addf %56, %58 : vector<1x128xf32>
    %60 = vector.broadcast %11 : f32 to vector<1x128xf32>
    %61 = arith.addf %59, %60 : vector<1x128xf32>
    %62 = math.tanh %61 : vector<1x128xf32>
    %63 = vector.broadcast %15 : f32 to vector<1x128xf32>
    %64 = arith.mulf %63, %62 : vector<1x128xf32>
    %65 = arith.addf %54, %64 : vector<1x128xf32>
    %c0_6 = arith.constant 0 : index
    %c0_7 = arith.constant 0 : index
    %66 = vector.load %arg3[%c0_6, %c0_7] : memref<1x128xf32, #tpu.memory_space<vmem>>, vector<1x128xf32>
    tpu.vector_store %arg3[%c0_6, %c0_7], %65 {strides = array<i32>} : memref<1x128xf32, #tpu.memory_space<vmem>>, vector<1x128xf32>,
    return
  }
  func.func @transform_0(%arg0: i32) -> i32 {
    %c0_i32 = arith.constant 0 : i32
    %c0_i32_0 = arith.constant 0 : i32
    return %c0_i32 : i32
  }
  func.func @transform_1(%arg0: i32) -> (i32, i32, i32) {
    %c0_i32 = arith.constant 0 : i32
    %c0_i32_0 = arith.constant 0 : i32
    %c0_i32_1 = arith.constant 0 : i32
    return %c0_i32, %arg0, %c0_i32_0 : i32, i32, i32
  }
  func.func @transform_2(%arg0: i32) -> (i32, i32) {
    %c0_i32 = arith.constant 0 : i32
    %c0_i32_0 = arith.constant 0 : i32
    return %arg0, %c0_i32 : i32, i32
  }
}

</mosaic_0001>

<bundles_post_ra>
// kernel: mlp_forward.1
= control target key start
LH: loop header
LB: loop body
LE: loop exit
PB: predicated region body
PF: predicated region fallthrough
CT: control target
= control target key end

     0   :  { %7 = vsyncpa [#allocation3], 0  ;;  %s163_s0 = inlined_call_operand.vmem [shape: f32[17], index: 0, kind: input, shape index: {}]   ;;  %s164_s1 = inlined_call_operand.vmem [shape: f32[2,1,128], index: 1, kind: input, shape index: {}]   ;;  %s165_s2 = inlined_call_operand.vmem [shape: f32[1,128], index: 2, kind: output, shape index: {}]  }
   0x1   :  { %s14_s11 = sshll.u32 %s163_s0, 4  ;;  %s15_s11 = int_to_ptr.vmem [resolvable:$true] %s14_s11 }
   0x2   :  { %s121_s12 = scalar_lea.vmem %s15_s11, 16  ;;  %p126_p1 = scmp.lt.s32.totalorder %s15_s11, %s15_s11 }
   0x3   :  { %p122_p0 = scmp.ne.s32.totalorder %s15_s11, %s121_s12  ;;  %p127_p2 = scmp.lt.s32.totalorder %s121_s12, %s121_s12 }
   0x5   :  { %p128_p3 = por %p127_p2, %p126_p1 }
   0x7   :  { %p129_p4 = pnand %p128_p3, %p122_p0 }
   0x9   :  { %132 = shalt.err (!%p129_p4)
}
   0xa   :  { %s135_s13 = smov [#allocation2]  }
   0xb   :  { %17 = dma.vmem_to_smem %s15_s11, 16, %s135_s13, [#allocation3]  }
   0xc   :  { %133 = dma.done.wait [#allocation3], 16  }
   0xd   :  { %134 = vsyncadd [#allocation3], 4294967280 }
   0xe   :  { %23 = sfence }
   0xf   :  { %s24_s14 = sld [smem:[#allocation2]]  ;;  %s95_s15 = sld [smem:[#allocation2 + $0x1]]  ;;  %v41_v0 = vld [vmem:[%s164_s1] sm:$0x1]  ;;  %v111_v1 = vld [vmem:[%s164_s1 + $0x1] sm:$0x1] }
  0x10   :  { %s96_s16 = sld [smem:[#allocation2 + $0x2]]  ;;  %s97_s17 = sld [smem:[#allocation2 + $0x3]] }
  0x11   :  { %s98_s18 = sld [smem:[#allocation2 + $0x4]]  ;;  %s99_s19 = sld [smem:[#allocation2 + $0x5]] }
  0x12   :  { %s100_s0 = sld [smem:[#allocation2 + $0x6]]  ;;  %s101_s20 = sld [smem:[#allocation2 + $0x7]] }
  0x13   :  { %s102_s21 = sld [smem:[#allocation2 + $0x8]]  ;;  %s103_s22 = sld [smem:[#allocation2 + $0x9]] }
  0x14   :  { %s104_s25 = sld [smem:[#allocation2 + $0xa]]  ;;  %s105_s26 = sld [smem:[#allocation2 + $0xb]] }
  0x15   :  { %v44_v2 = vstv %s24_s14  ;;  %v56_v3 = vstv %s95_s15  ;;  %s106_s1 = sld [smem:[#allocation2 + $0xc]]  ;;  %s107_s29 = sld [smem:[#allocation2 + $0xd]] }
  0x16   :  { %v45_v4 = vmul.f32 %v44_v2, %v41_v0  ;;  %v57_v5 = vmul.f32 %v56_v3, %v41_v0  ;;  %v67_v6 = vstv %s96_s16  ;;  %v78_v7 = vstv %s97_s17  ;;  %s108_s30 = sld [smem:[#allocation2 + $0xe]]  ;;  %s110_s3 = sld [smem:[#allocation2 + $0x10]] }
  0x17   :  { %v46_v8 = vstv %s98_s18  ;;  %v58_v9 = vstv %s99_s19  ;;  %v68_v10 = vmul.f32 %v67_v6, %v41_v0  ;;  %v79_v11 = vmul.f32 %v78_v7, %v41_v0  ;;  %s109_s4 = sld [smem:[#allocation2 + $0xf]] }
  0x18   :  { %v47_v12 = vmul.f32 %v111_v1, %v46_v8  ;;  %v59_v13 = vmul.f32 %v111_v1, %v58_v9  ;;  %v69_v14 = vstv %s100_s0  ;;  %v80_v15 = vstv %s101_s20 }
  0x19   :  { %v49_v16 = vstv %s102_s21  ;;  %v61_v17 = vstv %s103_s22  ;;  %v70_v18 = vmul.f32 %v111_v1, %v69_v14  ;;  %v81_v19 = vmul.f32 %v111_v1, %v80_v15 }
  0x1a   :  { %v48_v20 = vadd.f32 %v47_v12, %v45_v4  ;;  %v60_v21 = vadd.f32 %v59_v13, %v57_v5  ;;  %v72_v22 = vstv %s104_s25  ;;  %v83_v23 = vstv %s105_s26 }
  0x1b   :  { %v71_v24 = vadd.f32 %v70_v18, %v68_v10  ;;  %v82_v25 = vadd.f32 %v81_v19, %v79_v11  ;;  %v52_v30 = vstv %s106_s1  ;;  %v64_v31 = vstv %s107_s29 }
  0x1c   :  { %v50_v26 = vadd.f32 %v49_v16, %v48_v20  ;;  %v62_v27 = vadd.f32 %v61_v17, %v60_v21  ;;  %v54_v33 = vstv %s110_s3  ;;  %v75_v34 = vstv %s108_s30 }
  0x1d   :  { %v73_v28 = vadd.f32 %v72_v22, %v71_v24  ;;  %v84_v29 = vadd.f32 %v83_v23, %v82_v25  ;;  %v86_v39 = vstv %s109_s4 }
  0x1e   :  { %113 = vtanh.f32 %v50_v26 }
  0x1f   :  { %115 = vtanh.f32 %v62_v27 }
  0x20   :  { %117 = vtanh.f32 %v73_v28 }
  0x21   :  { %119 = vtanh.f32 %v84_v29 }
  0x28   :  { %v114_v32 = vpop.eup %113 }
  0x29   :  { %v116_v35 = vpop.eup %115  ;;  %v53_v36 = vmul.f32 %v114_v32, %v52_v30 }
  0x2a   :  { %v118_v37 = vpop.eup %117  ;;  %v65_v38 = vmul.f32 %v116_v35, %v64_v31 }
  0x2b   :  { %v120_v40 = vpop.eup %119  ;;  %v55_v41 = vadd.f32 %v54_v33, %v53_v36  ;;  %v76_v42 = vmul.f32 %v118_v37, %v75_v34 }
  0x2c   :  { %v87_v44 = vmul.f32 %v120_v40, %v86_v39 }
  0x2d   :  { %v66_v43 = vadd.f32 %v65_v38, %v55_v41 }
  0x2f   :  { %v77_v45 = vadd.f32 %v76_v42, %v66_v43 }
  0x31   :  { %v88_v46 = vadd.f32 %v87_v44, %v77_v45 }
  0x33   :  { %89 = vst [vmem:[%s165_s2] sm:$0x1] %v88_v46 }
  0x34   :  { %94 = vsyncpa [#allocation3], 1 }

</bundles_post_ra>
